<compile_context>
chip_gen: v7x
topology: tpu7x:2x2x1
jax: 0.10.0
libtpu: 0.0.40
codegen_flags: <defaults>
</compile_context>

<pallas_src>
import functools

import jax
import jax.numpy as jnp
from jax.experimental import pallas as pl
from jax.experimental.pallas import tpu as pltpu

_BN_EPS = 1e-5


def _round_up(x, m):
    return (x + m - 1) // m * m


def _pick_tile(dim, max_tile, align):
    """Largest tile (multiple of `align`, <= max_tile) minimizing padding of `dim`."""
    if dim <= max_tile:
        return _round_up(dim, align)
    best_t, best_pad = align, _round_up(dim, align)
    for t in range(align, max_tile + 1, align):
        pad = _round_up(dim, t)
        if pad < best_pad or (pad == best_pad and t > best_t):
            best_t, best_pad = t, pad
    return best_t


# ----------------------------- Pallas kernel ------------------------------ #
def _matmul_bn_kernel(*refs, relu, shortcut):
    """Tiled  out = relu?((patches @ W_folded) + bias (+ shortcut)).

    Grid = (N, P_tiles, Cout_tiles, K_tiles); K (axis 3) is the reduction.
    shortcut: "none" | "add" (identity residual) | "proj" (fused 1x1 conv).
    """
    r_ref = sp_ref = sw_ref = None
    if shortcut == "add":
        p_ref, w_ref, b_ref, r_ref, o_ref, acc_ref = refs
    elif shortcut == "proj":
        p_ref, w_ref, b_ref, sp_ref, sw_ref, o_ref, acc_ref = refs
    else:
        p_ref, w_ref, b_ref, o_ref, acc_ref = refs

    k = pl.program_id(3)

    @pl.when(k == 0)
    def _init():
        if shortcut == "proj":
            # Initialize the accumulator with the projection shortcut
            # (1x1 conv, BN scale folded into sw) instead of zeros.
            acc_ref[...] = jnp.dot(sp_ref[0], sw_ref[...],
                                   preferred_element_type=jnp.float32)
        else:
            acc_ref[...] = jnp.zeros_like(acc_ref)

    # bf16 operands, f32 accumulation on the MXU.
    acc_ref[...] += jnp.dot(p_ref[0], w_ref[...],
                            preferred_element_type=jnp.float32)

    @pl.when(k == pl.num_programs(3) - 1)
    def _epilogue():
        out = acc_ref[...] + b_ref[...].astype(jnp.float32)
        if shortcut == "add":
            out = out + r_ref[0].astype(jnp.float32)
        if relu:
            out = jnp.maximum(out, 0.0)
        o_ref[0] = out.astype(o_ref.dtype)


def conv_bn_pallas(patches, w_mat, bias, *, residual=None, sc_patches=None,
                   sc_w=None, relu=False, out_dtype=jnp.float32):
    """patches: (N, P, K), w_mat: (K, Cout) with BN scale pre-folded, bias: (Cout,).
    Optional identity residual (N, P, Cout) or fused projection shortcut
    (sc_patches: (N, P, Cin), sc_w: (Cin, Cout)).  Returns (N, P, Cout)."""
    N, P, K = patches.shape
    Cout = w_mat.shape[1]
    if residual is not None:
        shortcut = "add"
    elif sc_patches is not None:
        shortcut = "proj"
    else:
        shortcut = "none"

    # Tile sizes: lane-dense (multiples of 128) on K / Cout; TP multiple of 16
    # (bf16 sublane packing).  Tiles chosen to minimize padding, then the
    # padded extents are exact multiples of the tiles (no K over-padding).
    TP = _pick_tile(P, 512, 16)
    Pp = _round_up(P, TP)
    Kp0 = _round_up(K, 128)
    TK = _pick_tile(Kp0, 1024, 128)
    Kp = _round_up(Kp0, TK)
    Cp0 = _round_up(Cout, 128)
    TN = _pick_tile(Cp0, 512, 128)
    Cp = _round_up(Cp0, TN)

    p = jnp.pad(patches.astype(jnp.bfloat16), ((0, 0), (0, Pp - P), (0, Kp - K)))
    w = jnp.pad(w_mat.astype(jnp.bfloat16), ((0, Kp - K), (0, Cp - Cout)))
    b = jnp.pad(bias.astype(jnp.float32), (0, Cp - Cout)).reshape(1, Cp)

    in_specs = [
        pl.BlockSpec((1, TP, TK), lambda n, i, j, k: (n, i, k)),
        pl.BlockSpec((TK, TN), lambda n, i, j, k: (k, j)),
        pl.BlockSpec((1, TN), lambda n, i, j, k: (0, j)),
    ]
    args = [p, w, b]

    Ks = 0
    if shortcut == "add":
        r = jnp.pad(residual.astype(jnp.bfloat16),
                    ((0, 0), (0, Pp - P), (0, Cp - Cout)))
        in_specs.append(pl.BlockSpec((1, TP, TN), lambda n, i, j, k: (n, i, j)))
        args.append(r)
    elif shortcut == "proj":
        Ksrc = sc_patches.shape[2]
        Ks = _round_up(Ksrc, 128)
        sp = jnp.pad(sc_patches.astype(jnp.bfloat16),
                     ((0, 0), (0, Pp - P), (0, Ks - Ksrc)))
        sw = jnp.pad(sc_w.astype(jnp.bfloat16), ((0, Ks - Ksrc), (0, Cp - Cout)))
        in_specs.append(pl.BlockSpec((1, TP, Ks), lambda n, i, j, k: (n, i, 0)))
        in_specs.append(pl.BlockSpec((Ks, TN), lambda n, i, j, k: (0, j)))
        args += [sp, sw]

    grid = (N, Pp // TP, Cp // TN, Kp // TK)

    out_itemsize = jnp.dtype(out_dtype).itemsize
    flops = 2 * N * Pp * Kp * Cp + (2 * N * Pp * Ks * Cp if shortcut == "proj" else 0)
    bytes_accessed = (p.size * 2 + w.size * 2 + b.size * 4
                      + (N * Pp * Cp * 2 if shortcut == "add" else 0)
                      + ((N * Pp * Ks + Ks * Cp) * 2 if shortcut == "proj" else 0)
                      + N * Pp * Cp * out_itemsize)

    # Explicit VMEM budget: working set (double-buffered) plus headroom, capped
    # so the same configuration is safe on v7x's 64 MiB physical VMEM.
    est = 2 * TP * TK * 2 + 2 * TK * TN * 2 + 2 * TN * 4
    if shortcut == "add":
        est += 2 * TP * TN * 2
    elif shortcut == "proj":
        est += 2 * TP * Ks * 2 + 2 * Ks * TN * 2
    est += 2 * TP * TN * out_itemsize + TP * TN * 4
    vmem_limit = int(min(max(4 * est, 32 * 2**20), 48 * 2**20))

    out = pl.pallas_call(
        functools.partial(_matmul_bn_kernel, relu=relu, shortcut=shortcut),
        out_shape=jax.ShapeDtypeStruct((N, Pp, Cp), out_dtype),
        grid=grid,
        in_specs=in_specs,
        out_specs=pl.BlockSpec((1, TP, TN), lambda n, i, j, k: (n, i, j)),
        scratch_shapes=[pltpu.VMEM((TP, TN), jnp.float32)],
        compiler_params=pltpu.CompilerParams(
            dimension_semantics=("parallel", "parallel", "parallel", "arbitrary"),
            vmem_limit_bytes=vmem_limit),
        cost_estimate=pl.CostEstimate(flops=flops, transcendentals=0,
                                      bytes_accessed=bytes_accessed),
    )(*args)

    if Pp == P and Cp == Cout:
        return out
    return out[:, :P, :Cout]


# ------------------------------- JAX glue --------------------------------- #
def im2col_3x3(x_nhwc, stride):
    """3x3 / pad=1 patch extraction.  Returns (N, Hout*Wout, 9*C), Hout, Wout."""
    N, H, W, C = x_nhwc.shape
    xp = jnp.pad(x_nhwc, ((0, 0), (1, 1), (1, 1), (0, 0)))
    Hout = (H + 2 - 3) // stride + 1
    Wout = (W + 2 - 3) // stride + 1
    cols = []
    for kh in range(3):
        for kw in range(3):
            cols.append(
                xp[:, kh:kh + stride * (Hout - 1) + 1:stride,
                      kw:kw + stride * (Wout - 1) + 1:stride, :]
            )
    patches = jnp.stack(cols, axis=-2)  # (N, Hout, Wout, 9, C)
    return patches.reshape(N, Hout * Wout, 9 * C), Hout, Wout


def _fold_bn(gamma, beta, mean, var):
    s = gamma / jnp.sqrt(var + _BN_EPS)
    return s, beta - mean * s


def basic_block_forward(x_nchw, params, stride):
    """Pallas implementation of BasicBlock.forward.  Input/output are NCHW."""
    N, Cin, H, W = x_nchw.shape
    Cout = params["w1"].shape[0]
    # NHWC, bf16 activations: every materialized patch/residual is 2 B/elem.
    x = jnp.transpose(x_nchw, (0, 2, 3, 1)).astype(jnp.bfloat16)

    # conv1 (3x3, stride) + bn1 + relu -- BN scale folded into weight columns;
    # output emitted in bf16 (it is only ever consumed as a bf16 MXU operand).
    p1, Ho, Wo = im2col_3x3(x, stride)
    s1, b1 = _fold_bn(*params["bn1"])
    w1 = jnp.transpose(params["w1"], (2, 3, 1, 0)).reshape(9 * Cin, Cout) * s1[None, :]
    y1 = conv_bn_pallas(p1, w1, b1, relu=True, out_dtype=jnp.bfloat16)

    # conv2 (3x3, stride 1) + bn2 + shortcut + relu  (final output in f32).
    p2, _, _ = im2col_3x3(y1.reshape(N, Ho, Wo, Cout), 1)
    s2, b2 = _fold_bn(*params["bn2"])
    w2 = jnp.transpose(params["w2"], (2, 3, 1, 0)).reshape(9 * Cout, Cout) * s2[None, :]

    if "ws" in params:
        # Projection shortcut (1x1 conv + BN) fused into the same kernel: the
        # accumulator is initialized with xs @ ws at k == 0 (no concat copy).
        xs = x[:, ::stride, ::stride, :].reshape(N, Ho * Wo, Cin)
        ss, bs = _fold_bn(*params["bns"])
        ws = jnp.transpose(params["ws"], (2, 3, 1, 0)).reshape(Cin, Cout) * ss[None, :]
        y2 = conv_bn_pallas(p2, w2, b2 + bs, sc_patches=xs, sc_w=ws,
                            relu=True, out_dtype=jnp.float32)
    else:
        # Identity shortcut: fused residual add (bf16 stream) in the epilogue.
        res = x.reshape(N, H * W, Cin)
        y2 = conv_bn_pallas(p2, w2, b2, residual=res, relu=True,
                            out_dtype=jnp.float32)

    return jnp.transpose(y2.reshape(N, Ho, Wo, Cout), (0, 3, 1, 2))


# ------------------------- deterministic parameters ------------------------ #
def init_params(key, in_channels, out_channels, stride):
    keys = jax.random.split(key, 6)

    def conv_w(k, shape):
        fan_in = shape[1] * shape[2] * shape[3]
        return jax.random.normal(k, shape, jnp.float32) * (2.0 / fan_in) ** 0.5

    def bn(k):
        k1, k2, k3, k4 = jax.random.split(k, 4)
        gamma = jax.random.uniform(k1, (out_channels,), jnp.float32, 0.5, 1.5)
        beta = jax.random.normal(k2, (out_channels,), jnp.float32) * 0.1
        mean = jax.random.normal(k3, (out_channels,), jnp.float32) * 0.1
        var = jax.random.uniform(k4, (out_channels,), jnp.float32, 0.5, 1.5)
        return (gamma, beta, mean, var)

    params = {
        "w1": conv_w(keys[0], (out_channels, in_channels, 3, 3)),
        "bn1": bn(keys[1]),
        "w2": conv_w(keys[2], (out_channels, out_channels, 3, 3)),
        "bn2": bn(keys[3]),
    }
    if stride != 1 or in_channels != out_channels:
        params["ws"] = conv_w(keys[4], (out_channels, in_channels, 1, 1))
        params["bns"] = bn(keys[5])
    return params


# ----------------------------- reference check ----------------------------- #
def _ref_block(x_nchw, params, stride):
    dn = ("NCHW", "OIHW", "NCHW")

    def conv(x, w, s, pad):
        return jax.lax.conv_general_dilated(x, w, (s, s), pad, dimension_numbers=dn)

    def bn(x, stats):
        gamma, beta, mean, var = stats
        s = gamma / jnp.sqrt(var + _BN_EPS)
        b = beta - mean * s
        return x * s[None, :, None, None] + b[None, :, None, None]

    out = conv(x_nchw, params["w1"], stride, ((1, 1), (1, 1)))
    out = jnp.maximum(bn(out, params["bn1"]), 0.0)
    out = conv(out, params["w2"], 1, ((1, 1), (1, 1)))
    out = bn(out, params["bn2"])
    if "ws" in params:
        sc = bn(conv(x_nchw, params["ws"], stride, ((0, 0), (0, 0))), params["bns"])
    else:
        sc = x_nchw
    return jnp.maximum(out + sc, 0.0)


def _assert_close(out, ref, tol=3e-2):
    # bf16 MXU operands / bf16 intermediates: compare relative to output scale.
    scale = jnp.max(jnp.abs(ref)) + 1e-6
    err = jnp.max(jnp.abs(out - ref)) / scale
    assert float(err) < tol, f"max rel-to-scale error {float(err)} >= {tol}"


# ----------------------------------- main ---------------------------------- #
if __name__ == "__main__":
    key = jax.random.PRNGKey(0)
    kx, kp1, kp2 = jax.random.split(key, 3)
    x = jax.random.normal(kx, (2, 4, 16, 16), jnp.float32)  # NCHW, like PyTorch

    fwd = jax.jit(basic_block_forward, static_argnames=("stride",))

    # Case 1: identity shortcut (in=out channels, stride=1)
    params_id = init_params(kp1, in_channels=4, out_channels=4, stride=1)
    out1 = jax.block_until_ready(fwd(x, params_id, stride=1))
    ref1 = _ref_block(x, params_id, 1)
    assert out1.shape == (2, 4, 16, 16)
    _assert_close(out1, ref1)

    # Case 2: projection shortcut (1x1 conv + BN, stride=2, channel expansion)
    params_pr = init_params(kp2, in_channels=4, out_channels=8, stride=2)
    out2 = jax.block_until_ready(fwd(x, params_pr, stride=2))
    ref2 = _ref_block(x, params_pr, 2)
    assert out2.shape == (2, 8, 8, 8)
    _assert_close(out2, ref2)

    print("KERNEL_OK")
</pallas_src>

<mosaic_0001>
module attributes {stable_mosaic.version = 11 : i64} {
  func.func @_matmul_bn_kernel(%arg0: i32, %arg1: i32, %arg2: i32, %arg3: i32, %arg4: memref<1x256x128xbf16, #tpu.memory_space<vmem>>, %arg5: memref<128x128xbf16, #tpu.memory_space<vmem>>, %arg6: memref<1x128xf32, #tpu.memory_space<vmem>>, %arg7: memref<1x256x128xbf16, #tpu.memory_space<vmem>>, %arg8: memref<256x128xf32, #tpu.memory_space<vmem>>) attributes {dimension_semantics = [#tpu.dimension_semantics<parallel>, #tpu.dimension_semantics<parallel>, #tpu.dimension_semantics<parallel>, #tpu.dimension_semantics<arbitrary>], iteration_bounds = array<i64: 2, 1, 1, 1>, scalar_prefetch = 0 : i64, scratch_operands = 1 : i64, tpu.core_type = #tpu.core_type<tc>, window_params = [{transform_indices = @transform_0, window_bounds = array<i64: 1, 256, 128>}, {transform_indices = @transform_1, window_bounds = array<i64: 128, 128>}, {transform_indices = @transform_2, window_bounds = array<i64: 1, 128>}, {transform_indices = @transform_3, window_bounds = array<i64: 1, 256, 128>}]} {
    %c0_i32 = arith.constant 0 : i32
    %0 = arith.cmpi eq, %arg3, %c0_i32 : i32
    %1 = arith.extui %0 : i1 to i32
    %c0_i32_0 = arith.constant 0 : i32
    %2 = arith.cmpi ne, %1, %c0_i32_0 : i32
    scf.if %2 {
      %cst_11 = arith.constant 0.000000e+00 : f32
      %13 = vector.broadcast %cst_11 : f32 to vector<256x128xf32>
      %c0_12 = arith.constant 0 : index
      %c0_13 = arith.constant 0 : index
      %14 = vector.load %arg8[%c0_12, %c0_13] : memref<256x128xf32, #tpu.memory_space<vmem>>, vector<256x128xf32>
      tpu.vector_store %arg8[%c0_12, %c0_13], %13 {strides = array<i32>} : memref<256x128xf32, #tpu.memory_space<vmem>>, vector<256x128xf32>,
    } else {
    }
    %c0 = arith.constant 0 : index
    %c0_1 = arith.constant 0 : index
    %3 = vector.load %arg8[%c0, %c0_1] : memref<256x128xf32, #tpu.memory_space<vmem>>, vector<256x128xf32>
    %c0_2 = arith.constant 0 : index
    %c0_3 = arith.constant 0 : index
    %c0_4 = arith.constant 0 : index
    %4 = vector.load %arg4[%c0_2, %c0_3, %c0_4] : memref<1x256x128xbf16, #tpu.memory_space<vmem>>, vector<1x256x128xbf16>
    %5 = vector.shape_cast %4 : vector<1x256x128xbf16> to vector<256x128xbf16>
    %c0_5 = arith.constant 0 : index
    %c0_6 = arith.constant 0 : index
    %6 = vector.load %arg5[%c0_5, %c0_6] : memref<128x128xbf16, #tpu.memory_space<vmem>>, vector<128x128xbf16>
    %cst = arith.constant dense<0.000000e+00> : vector<256x128xf32>
    %7 = tpu.matmul %5, %6, %cst {dimension_numbers = #tpu.dot_dimension_numbers<[1], [0], [0], [1], [0, 0, 1, 1], [], []>} : vector<256x128xbf16>, vector<128x128xbf16>, vector<256x128xf32> -> vector<256x128xf32>
    %8 = arith.addf %3, %7 : vector<256x128xf32>
    %c0_7 = arith.constant 0 : index
    %c0_8 = arith.constant 0 : index
    %9 = vector.load %arg8[%c0_7, %c0_8] : memref<256x128xf32, #tpu.memory_space<vmem>>, vector<256x128xf32>
    tpu.vector_store %arg8[%c0_7, %c0_8], %8 {strides = array<i32>} : memref<256x128xf32, #tpu.memory_space<vmem>>, vector<256x128xf32>,
    %c0_i32_9 = arith.constant 0 : i32
    %10 = arith.cmpi eq, %arg3, %c0_i32_9 : i32
    %11 = arith.extui %10 : i1 to i32
    %c0_i32_10 = arith.constant 0 : i32
    %12 = arith.cmpi ne, %11, %c0_i32_10 : i32
    scf.if %12 {
      %c0_11 = arith.constant 0 : index
      %c0_12 = arith.constant 0 : index
      %13 = vector.load %arg8[%c0_11, %c0_12] : memref<256x128xf32, #tpu.memory_space<vmem>>, vector<256x128xf32>
      %c0_13 = arith.constant 0 : index
      %c0_14 = arith.constant 0 : index
      %14 = vector.load %arg6[%c0_13, %c0_14] : memref<1x128xf32, #tpu.memory_space<vmem>>, vector<1x128xf32>
      %15 = vector.broadcast %14 : vector<1x128xf32> to vector<256x128xf32>
      %16 = arith.addf %13, %15 : vector<256x128xf32>
      %cst_15 = arith.constant 0.000000e+00 : f32
      %17 = vector.broadcast %cst_15 : f32 to vector<256x128xf32>
      %18 = arith.maximumf %16, %17 : vector<256x128xf32>
      %19 = arith.truncf %18 : vector<256x128xf32> to vector<256x128xbf16>
      %c0_16 = arith.constant 0 : index
      %c0_17 = arith.constant 0 : index
      %c0_18 = arith.constant 0 : index
      %20 = vector.load %arg7[%c0_16, %c0_17, %c0_18] : memref<1x256x128xbf16, #tpu.memory_space<vmem>>, vector<1x256x128xbf16>
      %21 = vector.shape_cast %20 : vector<1x256x128xbf16> to vector<256x128xbf16>
      %22 = vector.shape_cast %19 : vector<256x128xbf16> to vector<1x256x128xbf16>
      tpu.vector_store %arg7[%c0_16, %c0_17, %c0_18], %22 {strides = array<i32>} : memref<1x256x128xbf16, #tpu.memory_space<vmem>>, vector<1x256x128xbf16>,
    } else {
    }
    return
  }
  func.func @transform_0(%arg0: i32, %arg1: i32, %arg2: i32, %arg3: i32) -> (i32, i32, i32) {
    %c0_i32 = arith.constant 0 : i32
    return %arg0, %arg1, %arg3 : i32, i32, i32
  }
  func.func @transform_1(%arg0: i32, %arg1: i32, %arg2: i32, %arg3: i32) -> (i32, i32) {
    %c0_i32 = arith.constant 0 : i32
    return %arg3, %arg2 : i32, i32
  }
  func.func @transform_2(%arg0: i32, %arg1: i32, %arg2: i32, %arg3: i32) -> (i32, i32) {
    %c0_i32 = arith.constant 0 : i32
    %c0_i32_0 = arith.constant 0 : i32
    return %c0_i32, %arg2 : i32, i32
  }
  func.func @transform_3(%arg0: i32, %arg1: i32, %arg2: i32, %arg3: i32) -> (i32, i32, i32) {
    %c0_i32 = arith.constant 0 : i32
    return %arg0, %arg1, %arg2 : i32, i32, i32
  }
}

module attributes {stable_mosaic.version = 11 : i64} {
  func.func @_matmul_bn_kernel(%arg0: i32, %arg1: i32, %arg2: i32, %arg3: i32, %arg4: memref<1x256x128xbf16, #tpu.memory_space<vmem>>, %arg5: memref<128x128xbf16, #tpu.memory_space<vmem>>, %arg6: memref<1x128xf32, #tpu.memory_space<vmem>>, %arg7: memref<1x256x128xbf16, #tpu.memory_space<vmem>>, %arg8: memref<1x256x128xf32, #tpu.memory_space<vmem>>, %arg9: memref<256x128xf32, #tpu.memory_space<vmem>>) attributes {dimension_semantics = [#tpu.dimension_semantics<parallel>, #tpu.dimension_semantics<parallel>, #tpu.dimension_semantics<parallel>, #tpu.dimension_semantics<arbitrary>], iteration_bounds = array<i64: 2, 1, 1, 1>, scalar_prefetch = 0 : i64, scratch_operands = 1 : i64, tpu.core_type = #tpu.core_type<tc>, window_params = [{transform_indices = @transform_0, window_bounds = array<i64: 1, 256, 128>}, {transform_indices = @transform_1, window_bounds = array<i64: 128, 128>}, {transform_indices = @transform_2, window_bounds = array<i64: 1, 128>}, {transform_indices = @transform_3, window_bounds = array<i64: 1, 256, 128>}, {transform_indices = @transform_4, window_bounds = array<i64: 1, 256, 128>}]} {
    %c0_i32 = arith.constant 0 : i32
    %0 = arith.cmpi eq, %arg3, %c0_i32 : i32
    %1 = arith.extui %0 : i1 to i32
    %c0_i32_0 = arith.constant 0 : i32
    %2 = arith.cmpi ne, %1, %c0_i32_0 : i32
    scf.if %2 {
      %cst_11 = arith.constant 0.000000e+00 : f32
      %13 = vector.broadcast %cst_11 : f32 to vector<256x128xf32>
      %c0_12 = arith.constant 0 : index
      %c0_13 = arith.constant 0 : index
      %14 = vector.load %arg9[%c0_12, %c0_13] : memref<256x128xf32, #tpu.memory_space<vmem>>, vector<256x128xf32>
      tpu.vector_store %arg9[%c0_12, %c0_13], %13 {strides = array<i32>} : memref<256x128xf32, #tpu.memory_space<vmem>>, vector<256x128xf32>,
    } else {
    }
    %c0 = arith.constant 0 : index
    %c0_1 = arith.constant 0 : index
    %3 = vector.load %arg9[%c0, %c0_1] : memref<256x128xf32, #tpu.memory_space<vmem>>, vector<256x128xf32>
    %c0_2 = arith.constant 0 : index
    %c0_3 = arith.constant 0 : index
    %c0_4 = arith.constant 0 : index
    %4 = vector.load %arg4[%c0_2, %c0_3, %c0_4] : memref<1x256x128xbf16, #tpu.memory_space<vmem>>, vector<1x256x128xbf16>
    %5 = vector.shape_cast %4 : vector<1x256x128xbf16> to vector<256x128xbf16>
    %c0_5 = arith.constant 0 : index
    %c0_6 = arith.constant 0 : index
    %6 = vector.load %arg5[%c0_5, %c0_6] : memref<128x128xbf16, #tpu.memory_space<vmem>>, vector<128x128xbf16>
    %cst = arith.constant dense<0.000000e+00> : vector<256x128xf32>
    %7 = tpu.matmul %5, %6, %cst {dimension_numbers = #tpu.dot_dimension_numbers<[1], [0], [0], [1], [0, 0, 1, 1], [], []>} : vector<256x128xbf16>, vector<128x128xbf16>, vector<256x128xf32> -> vector<256x128xf32>
    %8 = arith.addf %3, %7 : vector<256x128xf32>
    %c0_7 = arith.constant 0 : index
    %c0_8 = arith.constant 0 : index
    %9 = vector.load %arg9[%c0_7, %c0_8] : memref<256x128xf32, #tpu.memory_space<vmem>>, vector<256x128xf32>
    tpu.vector_store %arg9[%c0_7, %c0_8], %8 {strides = array<i32>} : memref<256x128xf32, #tpu.memory_space<vmem>>, vector<256x128xf32>,
    %c0_i32_9 = arith.constant 0 : i32
    %10 = arith.cmpi eq, %arg3, %c0_i32_9 : i32
    %11 = arith.extui %10 : i1 to i32
    %c0_i32_10 = arith.constant 0 : i32
    %12 = arith.cmpi ne, %11, %c0_i32_10 : i32
    scf.if %12 {
      %c0_11 = arith.constant 0 : index
      %c0_12 = arith.constant 0 : index
      %13 = vector.load %arg9[%c0_11, %c0_12] : memref<256x128xf32, #tpu.memory_space<vmem>>, vector<256x128xf32>
      %c0_13 = arith.constant 0 : index
      %c0_14 = arith.constant 0 : index
      %14 = vector.load %arg6[%c0_13, %c0_14] : memref<1x128xf32, #tpu.memory_space<vmem>>, vector<1x128xf32>
      %15 = vector.broadcast %14 : vector<1x128xf32> to vector<256x128xf32>
      %16 = arith.addf %13, %15 : vector<256x128xf32>
      %c0_15 = arith.constant 0 : index
      %c0_16 = arith.constant 0 : index
      %c0_17 = arith.constant 0 : index
      %17 = vector.load %arg7[%c0_15, %c0_16, %c0_17] : memref<1x256x128xbf16, #tpu.memory_space<vmem>>, vector<1x256x128xbf16>
      %18 = vector.shape_cast %17 : vector<1x256x128xbf16> to vector<256x128xbf16>
      %19 = arith.extf %18 : vector<256x128xbf16> to vector<256x128xf32>
      %20 = arith.addf %16, %19 : vector<256x128xf32>
      %cst_18 = arith.constant 0.000000e+00 : f32
      %21 = vector.broadcast %cst_18 : f32 to vector<256x128xf32>
      %22 = arith.maximumf %20, %21 : vector<256x128xf32>
      %c0_19 = arith.constant 0 : index
      %c0_20 = arith.constant 0 : index
      %c0_21 = arith.constant 0 : index
      %23 = vector.load %arg8[%c0_19, %c0_20, %c0_21] : memref<1x256x128xf32, #tpu.memory_space<vmem>>, vector<1x256x128xf32>
      %24 = vector.shape_cast %23 : vector<1x256x128xf32> to vector<256x128xf32>
      %25 = vector.shape_cast %22 : vector<256x128xf32> to vector<1x256x128xf32>
      tpu.vector_store %arg8[%c0_19, %c0_20, %c0_21], %25 {strides = array<i32>} : memref<1x256x128xf32, #tpu.memory_space<vmem>>, vector<1x256x128xf32>,
    } else {
    }
    return
  }
  func.func @transform_0(%arg0: i32, %arg1: i32, %arg2: i32, %arg3: i32) -> (i32, i32, i32) {
    %c0_i32 = arith.constant 0 : i32
    return %arg0, %arg1, %arg3 : i32, i32, i32
  }
  func.func @transform_1(%arg0: i32, %arg1: i32, %arg2: i32, %arg3: i32) -> (i32, i32) {
    %c0_i32 = arith.constant 0 : i32
    return %arg3, %arg2 : i32, i32
  }
  func.func @transform_2(%arg0: i32, %arg1: i32, %arg2: i32, %arg3: i32) -> (i32, i32) {
    %c0_i32 = arith.constant 0 : i32
    %c0_i32_0 = arith.constant 0 : i32
    return %c0_i32, %arg2 : i32, i32
  }
  func.func @transform_3(%arg0: i32, %arg1: i32, %arg2: i32, %arg3: i32) -> (i32, i32, i32) {
    %c0_i32 = arith.constant 0 : i32
    return %arg0, %arg1, %arg2 : i32, i32, i32
  }
  func.func @transform_4(%arg0: i32, %arg1: i32, %arg2: i32, %arg3: i32) -> (i32, i32, i32) {
    %c0_i32 = arith.constant 0 : i32
    return %arg0, %arg1, %arg2 : i32, i32, i32
  }
}

</mosaic_0001>

<bundles_post_ra>
// kernel: basic_block_forward.2
= control target key start
LH: loop header
LB: loop body
LE: loop exit
PB: predicated region body
PF: predicated region fallthrough
CT: control target
= control target key end

     0   :  { %s1557_s12 = smov 0   ;;  %s1559_s13 = smov 0   ;;  %s1694_s0 = inlined_call_operand.vmem [shape: bf16[2,256,128], index: 0, kind: input, shape index: {}]   ;;  %s1695_s1 = inlined_call_operand.vmem [shape: bf16[128,128], index: 1, kind: input, shape index: {}]   ;;  %s1696_s2 = inlined_call_operand.vmem [shape: f32[1,128], index: 2, kind: input, shape index: {}]   ;;  %s1697_s3 = inlined_call_operand.vmem [shape: bf16[2,256,128], index: 3, kind: output, shape index: {}]  }
   0x1   :  { %s1561_s14 = smov 0  }
   0x2 LB: > { %s39_s15 = sadd.s32 1, %s1531_s13  ;;  %p1184_p0 = scmp.ge.s32.totalorder %s1535_s14, 1  ;;  %s1535_s14 = sphi %s1561_s14, %s13_s14   ;;  %s1531_s13 = sphi %s1559_s13, %s1699_s13   ;;  %s1527_s12 = sphi %s1557_s12, %s1698_s12  }
   0x3   : > { %p41_p1 = scmp.ge.s32.totalorder %s39_s15, 2  ;;  %p203_p2 = scmp.lt.s32.totalorder %s1535_s14, 3 }
   0x5   : > { %s1701_s15 = smov (%p41_p1, %s39_s15), 0  ;;  %p204_p3 = pnand %p1184_p0, %p203_p2 }
   0x6   : > { %v1489_v0 = vld [vmem:[%s1695_s1] sm:$0xff] (!%p204_p3)   ;;  %p253_p4 = scmp.lt.s32.totalorder (!%p204_p3), %s1527_s12, 1  ;;  %v1490_v1 = vld [vmem:[%s1695_s1 + $0x8] sm:$0xff] (!%p204_p3)   ;;  %v1491_v2 = vld [vmem:[%s1695_s1 + $0x10] sm:$0xff] (!%p204_p3)  }
   0x7   : > { %207 = sbr.rel (%p204_p3) target bundleno = 285 (0x11d), region = 32  ;;  %1401 = vmatprep.subr.bf16.mxu0 (!%p204_p3), %v1489_v0  ;;  %1449 = vmatprep.subr.bf16.mxu1 (!%p204_p3), %v1489_v0  ;;  %v1492_v3 = vld [vmem:[%s1695_s1 + $0x18] sm:$0xff] (!%p204_p3)   ;;  %v1493_v6 = vld [vmem:[%s1695_s1 + $0x20] sm:$0xff] (!%p204_p3)   ;;  %v1494_v7 = vld [vmem:[%s1695_s1 + $0x28] sm:$0xff] (!%p204_p3)  }
   0x8   : > { %1402 = vmatpush3.bf16.msra.mxu0 (!%p204_p3), %v1489_v0  ;;  %1457 = vmatpush3.bf16.msra.mxu1 (!%p204_p3), %v1489_v0  ;;  %v1495_v8 = vld [vmem:[%s1695_s1 + $0x30] sm:$0xff] (!%p204_p3)   ;;  %v1496_v9 = vld [vmem:[%s1695_s1 + $0x38] sm:$0xff] (!%p204_p3)   ;;  %v1628_v24 = vld [vmem:[%s1696_s2] ss:$0 sm:$0xff] (!%p204_p3) }
   0x9   : > { %1403 = vmatprep.subr.bf16.mxu0 (!%p204_p3), %v1490_v1  ;;  %1450 = vmatprep.subr.bf16.mxu1 (!%p204_p3), %v1490_v1 }
   0xc   : > { %1404 = vmatpush3.bf16.msra.mxu0 (!%p204_p3), %v1490_v1  ;;  %1458 = vmatpush3.bf16.msra.mxu1 (!%p204_p3), %v1490_v1 }
   0xd   : > { %1405 = vmatprep.subr.bf16.mxu0 (!%p204_p3), %v1491_v2  ;;  %1451 = vmatprep.subr.bf16.mxu1 (!%p204_p3), %v1491_v2 }
   0xe   : > { %s1703_s12 = smov (!%p253_p4, %s1527_s12), 1 }
   0xf   : > { %s1248_s22 = sshll.u32 %s1703_s12, 7 }
  0x10   : > { %s1592_s25 = scalar_lea.vmem %s1694_s0, %s1248_s22  ;;  %1406 = vmatpush3.bf16.msra.mxu0 %v1491_v2  ;;  %1459 = vmatpush3.bf16.msra.mxu1 %v1491_v2  ;;  %s1643_s17 = scalar_lea.vmem %s1697_s3, %s1248_s22 }
  0x11   : > { %v1497_v4 = vld [vmem:[%s1592_s25] sm:$0xff]   ;;  %1407 = vmatprep.subr.bf16.mxu0 %v1492_v3  ;;  %1452 = vmatprep.subr.bf16.mxu1 %v1492_v3  ;;  %v1499_v10 = vld [vmem:[%s1592_s25 + $0x8] sm:$0xff]   ;;  %v1501_v12 = vld [vmem:[%s1592_s25 + $0x10] sm:$0xff]  }
  0x12   : > { %v1498_v5 = vld [vmem:[%s1592_s25 + $0x40] sm:$0xff]   ;;  %1417 = vmatprep.mubr.bf16.mxu0 %v1497_v4  ;;  %v1500_v11 = vld [vmem:[%s1592_s25 + $0x48] sm:$0xff]   ;;  %v1502_v13 = vld [vmem:[%s1592_s25 + $0x50] sm:$0xff]  }
  0x13   : > { %1433 = vmatprep.mubr.bf16.mxu1 %v1498_v5  ;;  %v1503_v14 = vld [vmem:[%s1592_s25 + $0x18] sm:$0xff]   ;;  %v1505_v16 = vld [vmem:[%s1592_s25 + $0x20] sm:$0xff]   ;;  %v1507_v18 = vld [vmem:[%s1592_s25 + $0x28] sm:$0xff]  }
  0x14   : > { %1408 = vmatpush3.bf16.msra.mxu0 %v1492_v3  ;;  %1460 = vmatpush3.bf16.msra.mxu1 %v1492_v3  ;;  %v1504_v15 = vld [vmem:[%s1592_s25 + $0x58] sm:$0xff]   ;;  %v1506_v17 = vld [vmem:[%s1592_s25 + $0x60] sm:$0xff]   ;;  %v1508_v19 = vld [vmem:[%s1592_s25 + $0x68] sm:$0xff]  }
  0x15   : > { %1409 = vmatprep.subr.bf16.mxu0 %v1493_v6  ;;  %1453 = vmatprep.subr.bf16.mxu1 %v1493_v6  ;;  %v1509_v20 = vld [vmem:[%s1592_s25 + $0x30] sm:$0xff]   ;;  %v1511_v22 = vld [vmem:[%s1592_s25 + $0x38] sm:$0xff]  }
  0x16   : > { %v1510_v21 = vld [vmem:[%s1592_s25 + $0x70] sm:$0xff]   ;;  %v1512_v23 = vld [vmem:[%s1592_s25 + $0x78] sm:$0xff]  }
  0x18   : > { %1410 = vmatpush3.bf16.msra.mxu0 %v1493_v6  ;;  %1461 = vmatpush3.bf16.msra.mxu1 %v1493_v6 }
  0x19   : > { %1411 = vmatprep.subr.bf16.mxu0 %v1494_v7  ;;  %1454 = vmatprep.subr.bf16.mxu1 %v1494_v7 }
  0x1c   : > { %1412 = vmatpush3.bf16.msra.mxu0 %v1494_v7  ;;  %1462 = vmatpush3.bf16.msra.mxu1 %v1494_v7 }
  0x1d   : > { %1413 = vmatprep.subr.bf16.mxu0 %v1495_v8  ;;  %1455 = vmatprep.subr.bf16.mxu1 %v1495_v8 }
  0x20   : > { %1414 = vmatpush3.bf16.msra.mxu0 %v1495_v8  ;;  %1463 = vmatpush3.bf16.msra.mxu1 %v1495_v8 }
  0x21   : > { %1415 = vmatprep.subr.bf16.mxu0 %v1496_v9  ;;  %1456 = vmatprep.subr.bf16.mxu1 %v1496_v9 }
  0x24   : > { %1416 = vmatpush3.bf16.msra.mxu0 %v1496_v9  ;;  %1464 = vmatpush3.bf16.msra.mxu1 %v1496_v9 }
  0x27   : > { %1418 = vmatmul.mubr.bf16.vlgmr.msra.gmra.mrb[0].mxu0 %v1499_v10  ;;  %1434 = vmatmul.mubr.bf16.vlgmr.msra.gmra.mrb[0].mxu1 %v1500_v11 }
  0x28   : > { %1421 = vmatprep.mubr.bf16.mxu0 %v1501_v12  ;;  %1437 = vmatprep.mubr.bf16.mxu1 %v1502_v13 }
  0x2f   : > { %1422 = vmatmul.mubr.bf16.gmra.mrb[4].mxu0 %v1503_v14  ;;  %1438 = vmatmul.mubr.bf16.gmra.mrb[4].mxu1 %v1504_v15 }
  0x30   : > { %1425 = vmatprep.mubr.bf16.mxu0 %v1505_v16  ;;  %1441 = vmatprep.mubr.bf16.mxu1 %v1506_v17 }
  0x37   : > { %1426 = vmatmul.mubr.bf16.gmra.mrb[8].mxu0 %v1507_v18  ;;  %1442 = vmatmul.mubr.bf16.gmra.mrb[8].mxu1 %v1508_v19 }
  0x38   : > { %1429 = vmatprep.mubr.bf16.mxu0 %v1509_v20  ;;  %1445 = vmatprep.mubr.bf16.mxu1 %v1510_v21 }
  0x3f   : > { %1430 = vmatmul.mubr.bf16.gmra.mrb[12].mxu0 %v1511_v22  ;;  %1446 = vmatmul.mubr.bf16.gmra.mrb[12].mxu1 %v1512_v23 }
  0xfa   : > { %v1419_v25 = vpop.f32.mrb[0].mxu0  ;;  %v1435_v26 = vpop.f32.mrb[0].mxu1 }
  0xfb   : > { %v820_v27 = vadd.f32 %v1419_v25, %v1628_v24  ;;  %v836_v28 = vadd.f32 %v1435_v26, %v1628_v24  ;;  %v585_v29 = vpop.f32.mrb[1].mxu0  ;;  %v649_v30 = vpop.f32.mrb[1].mxu1 }
  0xfc   : > { %v818_v31 = vadd.f32 %v1628_v24, %v585_v29  ;;  %v834_v32 = vadd.f32 %v1628_v24, %v649_v30  ;;  %v1420_v33 = vpop.f32.mrb[2].mxu0  ;;  %v1436_v34 = vpop.f32.mrb[2].mxu1 }
  0xfd   : > { %v821_v35 = vadd.f32 %v1420_v33, %v1628_v24  ;;  %v837_v36 = vadd.f32 %v1436_v34, %v1628_v24  ;;  %v588_v37 = vpop.f32.mrb[3].mxu0  ;;  %v652_v38 = vpop.f32.mrb[3].mxu1  ;;  %v852_v41 = vmax.f32 %v820_v27, 0.0  ;;  %v868_v42 = vmax.f32 %v836_v28, 0.0 }
  0xfe   : > { %v819_v39 = vadd.f32 %v1628_v24, %v588_v37  ;;  %v835_v40 = vadd.f32 %v1628_v24, %v652_v38  ;;  %v850_v45 = vmax.f32 %v818_v31, 0.0  ;;  %v866_v46 = vmax.f32 %v834_v32, 0.0 }
  0xff   : > { %v853_v43 = vmax.f32 %v821_v35, 0.0  ;;  %v869_v44 = vmax.f32 %v837_v36, 0.0 }
 0x100   : > { %v851_v47 = vmax.f32 %v819_v39, 0.0  ;;  %v867_v48 = vmax.f32 %v835_v40, 0.0 }
 0x101   : > { %v1290_v49 = vpack.c.bf16 %v853_v43, %v852_v41  ;;  %v1330_v50 = vpack.c.bf16 %v869_v44, %v868_v42 }
 0x102   : > { %v1285_v51 = vpack.c.bf16 %v851_v47, %v850_v45  ;;  %v1325_v52 = vpack.c.bf16 %v867_v48, %v866_v46  ;;  %v1423_v53 = vpop.f32.mrb[4].mxu0  ;;  %v1439_v54 = vpop.f32.mrb[4].mxu1 }
 0x103   : > { %1362 = vst [vmem:[%s1643_s17 + $0x8] sm:$0xff] %v1290_v49   ;;  %1370 = vst [vmem:[%s1643_s17 + $0x48] sm:$0xff] %v1330_v50   ;;  %v824_v55 = vadd.f32 %v1423_v53, %v1628_v24  ;;  %v840_v56 = vadd.f32 %v1439_v54, %v1628_v24  ;;  %v601_v57 = vpop.f32.mrb[5].mxu0  ;;  %v665_v58 = vpop.f32.mrb[5].mxu1 }
 0x104   : > { %1286 = vst [vmem:[%s1643_s17] sm:$0xff] %v1285_v51   ;;  %1369 = vst [vmem:[%s1643_s17 + $0x40] sm:$0xff] %v1325_v52   ;;  %v822_v59 = vadd.f32 %v1628_v24, %v601_v57  ;;  %v838_v60 = vadd.f32 %v1628_v24, %v665_v58  ;;  %v1424_v61 = vpop.f32.mrb[6].mxu0  ;;  %v1440_v62 = vpop.f32.mrb[6].mxu1 }
 0x105   : > { %v825_v63 = vadd.f32 %v1424_v61, %v1628_v24  ;;  %v841_v0 = vadd.f32 %v1440_v62, %v1628_v24  ;;  %v604_v1 = vpop.f32.mrb[7].mxu0  ;;  %v668_v2 = vpop.f32.mrb[7].mxu1  ;;  %v856_v5 = vmax.f32 %v824_v55, 0.0  ;;  %v872_v6 = vmax.f32 %v840_v56, 0.0 }
 0x106   : > { %v823_v3 = vadd.f32 %v1628_v24, %v604_v1  ;;  %v839_v4 = vadd.f32 %v1628_v24, %v668_v2  ;;  %v854_v9 = vmax.f32 %v822_v59, 0.0  ;;  %v870_v10 = vmax.f32 %v838_v60, 0.0 }
 0x107   : > { %v857_v7 = vmax.f32 %v825_v63, 0.0  ;;  %v873_v8 = vmax.f32 %v841_v0, 0.0 }
 0x108   : > { %v855_v11 = vmax.f32 %v823_v3, 0.0  ;;  %v871_v12 = vmax.f32 %v839_v4, 0.0 }
 0x109   : > { %v1300_v13 = vpack.c.bf16 %v857_v7, %v856_v5  ;;  %v1340_v14 = vpack.c.bf16 %v873_v8, %v872_v6 }
 0x10a   : > { %v1295_v15 = vpack.c.bf16 %v855_v11, %v854_v9  ;;  %v1335_v16 = vpack.c.bf16 %v871_v12, %v870_v10  ;;  %v1427_v17 = vpop.f32.mrb[8].mxu0  ;;  %v1443_v18 = vpop.f32.mrb[8].mxu1 }
 0x10b   : > { %1364 = vst [vmem:[%s1643_s17 + $0x18] sm:$0xff] %v1300_v13   ;;  %1372 = vst [vmem:[%s1643_s17 + $0x58] sm:$0xff] %v1340_v14   ;;  %v828_v19 = vadd.f32 %v1427_v17, %v1628_v24  ;;  %v844_v20 = vadd.f32 %v1443_v18, %v1628_v24  ;;  %v617_v21 = vpop.f32.mrb[9].mxu0  ;;  %v681_v22 = vpop.f32.mrb[9].mxu1 }
 0x10c   : > { %1363 = vst [vmem:[%s1643_s17 + $0x10] sm:$0xff] %v1295_v15   ;;  %1371 = vst [vmem:[%s1643_s17 + $0x50] sm:$0xff] %v1335_v16   ;;  %v826_v23 = vadd.f32 %v1628_v24, %v617_v21  ;;  %v842_v25 = vadd.f32 %v1628_v24, %v681_v22  ;;  %v1428_v26 = vpop.f32.mrb[10].mxu0  ;;  %v1444_v27 = vpop.f32.mrb[10].mxu1 }
 0x10d   : > { %v829_v28 = vadd.f32 %v1428_v26, %v1628_v24  ;;  %v845_v29 = vadd.f32 %v1444_v27, %v1628_v24  ;;  %v620_v30 = vpop.f32.mrb[11].mxu0  ;;  %v684_v31 = vpop.f32.mrb[11].mxu1  ;;  %v860_v34 = vmax.f32 %v828_v19, 0.0  ;;  %v876_v35 = vmax.f32 %v844_v20, 0.0 }
 0x10e   : > { %v827_v32 = vadd.f32 %v1628_v24, %v620_v30  ;;  %v843_v33 = vadd.f32 %v1628_v24, %v684_v31  ;;  %v858_v38 = vmax.f32 %v826_v23, 0.0  ;;  %v874_v39 = vmax.f32 %v842_v25, 0.0 }
 0x10f   : > { %v861_v36 = vmax.f32 %v829_v28, 0.0  ;;  %v877_v37 = vmax.f32 %v845_v29, 0.0 }
 0x110   : > { %v859_v40 = vmax.f32 %v827_v32, 0.0  ;;  %v875_v41 = vmax.f32 %v843_v33, 0.0 }
 0x111   : > { %v1310_v42 = vpack.c.bf16 %v861_v36, %v860_v34  ;;  %v1350_v43 = vpack.c.bf16 %v877_v37, %v876_v35 }
 0x112   : > { %v1305_v44 = vpack.c.bf16 %v859_v40, %v858_v38  ;;  %v1345_v45 = vpack.c.bf16 %v875_v41, %v874_v39  ;;  %v1431_v46 = vpop.f32.mrb[12].mxu0  ;;  %v1447_v47 = vpop.f32.mrb[12].mxu1 }
 0x113   : > { %1366 = vst [vmem:[%s1643_s17 + $0x28] sm:$0xff] %v1310_v42   ;;  %1374 = vst [vmem:[%s1643_s17 + $0x68] sm:$0xff] %v1350_v43   ;;  %v832_v48 = vadd.f32 %v1431_v46, %v1628_v24  ;;  %v848_v49 = vadd.f32 %v1447_v47, %v1628_v24  ;;  %v633_v50 = vpop.f32.mrb[13].mxu0  ;;  %v697_v51 = vpop.f32.mrb[13].mxu1 }
 0x114   : > { %1365 = vst [vmem:[%s1643_s17 + $0x20] sm:$0xff] %v1305_v44   ;;  %1373 = vst [vmem:[%s1643_s17 + $0x60] sm:$0xff] %v1345_v45   ;;  %v830_v52 = vadd.f32 %v1628_v24, %v633_v50  ;;  %v846_v53 = vadd.f32 %v1628_v24, %v697_v51  ;;  %v1432_v54 = vpop.f32.mrb[14].mxu0  ;;  %v1448_v55 = vpop.f32.mrb[14].mxu1 }
 0x115   : > { %v833_v56 = vadd.f32 %v1432_v54, %v1628_v24  ;;  %v849_v57 = vadd.f32 %v1448_v55, %v1628_v24  ;;  %v636_v58 = vpop.f32.mrb[15].mxu0  ;;  %v700_v59 = vpop.f32.mrb[15].mxu1  ;;  %v864_v62 = vmax.f32 %v832_v48, 0.0  ;;  %v880_v63 = vmax.f32 %v848_v49, 0.0 }
 0x116   : > { %v831_v60 = vadd.f32 %v1628_v24, %v636_v58  ;;  %v847_v61 = vadd.f32 %v1628_v24, %v700_v59  ;;  %v862_v2 = vmax.f32 %v830_v52, 0.0  ;;  %v878_v3 = vmax.f32 %v846_v53, 0.0 }
 0x117   : > { %v865_v0 = vmax.f32 %v833_v56, 0.0  ;;  %v881_v1 = vmax.f32 %v849_v57, 0.0 }
 0x118   : > { %v863_v4 = vmax.f32 %v831_v60, 0.0  ;;  %v879_v5 = vmax.f32 %v847_v61, 0.0 }
 0x119   : > { %v1320_v6 = vpack.c.bf16 %v865_v0, %v864_v62  ;;  %v1360_v7 = vpack.c.bf16 %v881_v1, %v880_v63 }
 0x11a   : > { %v1315_v8 = vpack.c.bf16 %v863_v4, %v862_v2  ;;  %v1355_v9 = vpack.c.bf16 %v879_v5, %v878_v3 }
 0x11b   : > { %1368 = vst [vmem:[%s1643_s17 + $0x38] sm:$0xff] %v1320_v6   ;;  %1376 = vst [vmem:[%s1643_s17 + $0x78] sm:$0xff] %v1360_v7  }
 0x11c   : > { %1367 = vst [vmem:[%s1643_s17 + $0x30] sm:$0xff] %v1315_v8   ;;  %1375 = vst [vmem:[%s1643_s17 + $0x70] sm:$0xff] %v1355_v9  }
 0x11d PF: > { %s13_s14 = sadd.s32 1, %s1535_s14   ;;  %s1698_s12 = smov %s1531_s13 }
 0x11e   : > { %p10_p5 = scmp.ge.s32.totalorder %s13_s14, 4   ;;  %s1699_s13 = smov %s1701_s15 }
 0x120   :  { %12 = sbr.rel (!%p10_p5) target bundleno = 2 (0x2), region = 76 }

// kernel: basic_block_forward.3
= control target key start
LH: loop header
LB: loop body
LE: loop exit
PB: predicated region body
PF: predicated region fallthrough
CT: control target
= control target key end

     0   :  { %s1548_s15 = smov 0   ;;  %s1550_s16 = smov 0   ;;  %s1723_s0 = inlined_call_operand.vmem [shape: bf16[2,256,128], index: 0, kind: input, shape index: {}]   ;;  %s1724_s1 = inlined_call_operand.vmem [shape: bf16[128,128], index: 1, kind: input, shape index: {}]   ;;  %s1725_s2 = inlined_call_operand.vmem [shape: f32[1,128], index: 2, kind: input, shape index: {}]   ;;  %s1726_s3 = inlined_call_operand.vmem [shape: bf16[2,256,128], index: 3, kind: input, shape index: {}]   ;;  %s1727_s4 = inlined_call_operand.vmem [shape: f32[2,256,128], index: 4, kind: output, shape index: {}]  }
   0x1   :  { %s1552_s17 = smov 0  }
   0x2 LB: > { %s40_s18 = sadd.s32 1, %s1517_s16  ;;  %p1247_p0 = scmp.ge.s32.totalorder %s1521_s17, 1  ;;  %s1521_s17 = sphi %s1552_s17, %s14_s17   ;;  %s1517_s16 = sphi %s1550_s16, %s1729_s16   ;;  %s1513_s15 = sphi %s1548_s15, %s1728_s15  }
   0x3   : > { %p42_p1 = scmp.ge.s32.totalorder %s40_s18, 2  ;;  %p250_p2 = scmp.lt.s32.totalorder %s1521_s17, 3 }
   0x5   : > { %s1731_s18 = smov (%p42_p1, %s40_s18), 0  ;;  %p251_p3 = pnand %p1247_p0, %p250_p2 }
   0x6   : > { %v1475_v0 = vld [vmem:[%s1724_s1] sm:$0xff] (!%p251_p3)   ;;  %p314_p4 = scmp.lt.s32.totalorder (!%p251_p3), %s1513_s15, 1  ;;  %v1476_v1 = vld [vmem:[%s1724_s1 + $0x8] sm:$0xff] (!%p251_p3)   ;;  %v1477_v2 = vld [vmem:[%s1724_s1 + $0x10] sm:$0xff] (!%p251_p3)  }
   0x7   : > { %254 = sbr.rel (%p251_p3) target bundleno = 285 (0x11d), region = 36  ;;  %1387 = vmatprep.subr.bf16.mxu0 (!%p251_p3), %v1475_v0  ;;  %1435 = vmatprep.subr.bf16.mxu1 (!%p251_p3), %v1475_v0  ;;  %v1478_v3 = vld [vmem:[%s1724_s1 + $0x18] sm:$0xff] (!%p251_p3)   ;;  %v1479_v6 = vld [vmem:[%s1724_s1 + $0x20] sm:$0xff] (!%p251_p3)   ;;  %v1480_v7 = vld [vmem:[%s1724_s1 + $0x28] sm:$0xff] (!%p251_p3)  }
   0x8   : > { %1388 = vmatpush3.bf16.msra.mxu0 (!%p251_p3), %v1475_v0  ;;  %1443 = vmatpush3.bf16.msra.mxu1 (!%p251_p3), %v1475_v0  ;;  %v1481_v8 = vld [vmem:[%s1724_s1 + $0x30] sm:$0xff] (!%p251_p3)   ;;  %v1482_v9 = vld [vmem:[%s1724_s1 + $0x38] sm:$0xff] (!%p251_p3)   ;;  %v1630_v28 = vld [vmem:[%s1725_s2] ss:$0 sm:$0xff] (!%p251_p3) }
   0x9   : > { %1389 = vmatprep.subr.bf16.mxu0 (!%p251_p3), %v1476_v1  ;;  %1436 = vmatprep.subr.bf16.mxu1 (!%p251_p3), %v1476_v1 }
   0xc   : > { %1390 = vmatpush3.bf16.msra.mxu0 (!%p251_p3), %v1476_v1  ;;  %1444 = vmatpush3.bf16.msra.mxu1 (!%p251_p3), %v1476_v1 }
   0xd   : > { %1391 = vmatprep.subr.bf16.mxu0 (!%p251_p3), %v1477_v2  ;;  %1437 = vmatprep.subr.bf16.mxu1 (!%p251_p3), %v1477_v2 }
   0xe   : > { %s1733_s15 = smov (!%p314_p4, %s1513_s15), 1 }
   0xf   : > { %s1281_s25 = sshll.u32 %s1733_s15, 7  ;;  %s1283_s22 = sshll.u32 %s1733_s15, 8 }
  0x10   : > { %s1583_s28 = scalar_lea.vmem %s1723_s0, %s1281_s25  ;;  %1392 = vmatpush3.bf16.msra.mxu0 %v1477_v2  ;;  %1445 = vmatpush3.bf16.msra.mxu1 %v1477_v2  ;;  %s1621_s19 = scalar_lea.vmem %s1726_s3, %s1281_s25 }
  0x11   : > { %v1483_v4 = vld [vmem:[%s1583_s28] sm:$0xff]   ;;  %1393 = vmatprep.subr.bf16.mxu0 %v1478_v3  ;;  %1438 = vmatprep.subr.bf16.mxu1 %v1478_v3  ;;  %v1485_v10 = vld [vmem:[%s1583_s28 + $0x8] sm:$0xff]   ;;  %v1487_v12 = vld [vmem:[%s1583_s28 + $0x10] sm:$0xff]   ;;  %s1642_s24 = scalar_lea.vmem %s1727_s4, %s1283_s22 }
  0x12   : > { %v1484_v5 = vld [vmem:[%s1583_s28 + $0x40] sm:$0xff]   ;;  %1403 = vmatprep.mubr.bf16.mxu0 %v1483_v4  ;;  %v1486_v11 = vld [vmem:[%s1583_s28 + $0x48] sm:$0xff]   ;;  %v1488_v13 = vld [vmem:[%s1583_s28 + $0x50] sm:$0xff]  }
  0x13   : > { %1419 = vmatprep.mubr.bf16.mxu1 %v1484_v5  ;;  %v1489_v14 = vld [vmem:[%s1583_s28 + $0x18] sm:$0xff]   ;;  %v1491_v16 = vld [vmem:[%s1583_s28 + $0x20] sm:$0xff]   ;;  %v1493_v18 = vld [vmem:[%s1583_s28 + $0x28] sm:$0xff]  }
  0x14   : > { %1394 = vmatpush3.bf16.msra.mxu0 %v1478_v3  ;;  %1446 = vmatpush3.bf16.msra.mxu1 %v1478_v3  ;;  %v1490_v15 = vld [vmem:[%s1583_s28 + $0x58] sm:$0xff]   ;;  %v1492_v17 = vld [vmem:[%s1583_s28 + $0x60] sm:$0xff]   ;;  %v1494_v19 = vld [vmem:[%s1583_s28 + $0x68] sm:$0xff]  }
  0x15   : > { %1395 = vmatprep.subr.bf16.mxu0 %v1479_v6  ;;  %1439 = vmatprep.subr.bf16.mxu1 %v1479_v6  ;;  %v1495_v20 = vld [vmem:[%s1583_s28 + $0x30] sm:$0xff]   ;;  %v1497_v22 = vld [vmem:[%s1583_s28 + $0x38] sm:$0xff]   ;;  %v1348_v24 = vld [vmem:[%s1621_s19 + $0x8] sm:$0xff]  }
  0x16   : > { %v1496_v21 = vld [vmem:[%s1583_s28 + $0x70] sm:$0xff]   ;;  %v1498_v23 = vld [vmem:[%s1583_s28 + $0x78] sm:$0xff]   ;;  %v1356_v25 = vld [vmem:[%s1621_s19 + $0x48] sm:$0xff]   ;;  %v1290_v29 = vunpack.c.l.bf16 %v1348_v24  ;;  %v1291_v39 = vunpack.c.h.bf16 %v1348_v24 }
  0x17   : > { %v1285_v26 = vld [vmem:[%s1621_s19] sm:$0xff]   ;;  %v1322_v30 = vunpack.c.l.bf16 %v1356_v25  ;;  %v1323_v40 = vunpack.c.h.bf16 %v1356_v25  ;;  %v1350_v57 = vld [vmem:[%s1621_s19 + $0x18] sm:$0xff]   ;;  %v1349_v63 = vld [vmem:[%s1621_s19 + $0x10] sm:$0xff]  }
  0x18   : > { %1396 = vmatpush3.bf16.msra.mxu0 %v1479_v6  ;;  %1447 = vmatpush3.bf16.msra.mxu1 %v1479_v6  ;;  %v1355_v27 = vld [vmem:[%s1621_s19 + $0x40] sm:$0xff]   ;;  %v1286_v33 = vunpack.c.l.bf16 %v1285_v26  ;;  %v1287_v45 = vunpack.c.h.bf16 %v1285_v26  ;;  %v1358_v58 = vld [vmem:[%s1621_s19 + $0x58] sm:$0xff]   ;;  %v1357_v0 = vld [vmem:[%s1621_s19 + $0x50] sm:$0xff]   ;;  %v1295_v25 = vunpack.c.h.bf16 %v1349_v63 }
  0x19   : > { %1397 = vmatprep.subr.bf16.mxu0 %v1480_v7  ;;  %1440 = vmatprep.subr.bf16.mxu1 %v1480_v7  ;;  %v1318_v34 = vunpack.c.l.bf16 %v1355_v27  ;;  %v1319_v46 = vunpack.c.h.bf16 %v1355_v27  ;;  %v1327_v26 = vunpack.c.h.bf16 %v1357_v0 }
  0x1c   : > { %1398 = vmatpush3.bf16.msra.mxu0 %v1480_v7  ;;  %1448 = vmatpush3.bf16.msra.mxu1 %v1480_v7  ;;  %v1298_v7 = vunpack.c.l.bf16 %v1350_v57 }
  0x1d   : > { %1399 = vmatprep.subr.bf16.mxu0 %v1481_v8  ;;  %1441 = vmatprep.subr.bf16.mxu1 %v1481_v8 }
  0x20   : > { %1400 = vmatpush3.bf16.msra.mxu0 %v1481_v8  ;;  %1449 = vmatpush3.bf16.msra.mxu1 %v1481_v8  ;;  %v1330_v8 = vunpack.c.l.bf16 %v1358_v58 }
  0x21   : > { %1401 = vmatprep.subr.bf16.mxu0 %v1482_v9  ;;  %1442 = vmatprep.subr.bf16.mxu1 %v1482_v9 }
  0x24   : > { %1402 = vmatpush3.bf16.msra.mxu0 %v1482_v9  ;;  %1450 = vmatpush3.bf16.msra.mxu1 %v1482_v9 }
  0x27   : > { %1404 = vmatmul.mubr.bf16.vlgmr.msra.gmra.mrb[0].mxu0 %v1485_v10  ;;  %1420 = vmatmul.mubr.bf16.vlgmr.msra.gmra.mrb[0].mxu1 %v1486_v11 }
  0x28   : > { %1407 = vmatprep.mubr.bf16.mxu0 %v1487_v12  ;;  %1423 = vmatprep.mubr.bf16.mxu1 %v1488_v13  ;;  %v1294_v13 = vunpack.c.l.bf16 %v1349_v63 }
  0x2f   : > { %1408 = vmatmul.mubr.bf16.gmra.mrb[4].mxu0 %v1489_v14  ;;  %1424 = vmatmul.mubr.bf16.gmra.mrb[4].mxu1 %v1490_v15  ;;  %v1326_v14 = vunpack.c.l.bf16 %v1357_v0 }
  0x30   : > { %1411 = vmatprep.mubr.bf16.mxu0 %v1491_v16  ;;  %1427 = vmatprep.mubr.bf16.mxu1 %v1492_v17 }
  0x37   : > { %1412 = vmatmul.mubr.bf16.gmra.mrb[8].mxu0 %v1493_v18  ;;  %1428 = vmatmul.mubr.bf16.gmra.mrb[8].mxu1 %v1494_v19  ;;  %v1299_v19 = vunpack.c.h.bf16 %v1350_v57 }
  0x38   : > { %1415 = vmatprep.mubr.bf16.mxu0 %v1495_v20  ;;  %1431 = vmatprep.mubr.bf16.mxu1 %v1496_v21  ;;  %v1331_v20 = vunpack.c.h.bf16 %v1358_v58 }
  0x3f   : > { %1416 = vmatmul.mubr.bf16.gmra.mrb[12].mxu0 %v1497_v22  ;;  %1432 = vmatmul.mubr.bf16.gmra.mrb[12].mxu1 %v1498_v23 }
  0xfa   : > { %v1405_v31 = vpop.f32.mrb[0].mxu0  ;;  %v1421_v32 = vpop.f32.mrb[0].mxu1 }
  0xfb   : > { %v894_v35 = vadd.f32 %v1405_v31, %v1630_v28  ;;  %v910_v36 = vadd.f32 %v1421_v32, %v1630_v28  ;;  %v659_v37 = vpop.f32.mrb[1].mxu0  ;;  %v723_v38 = vpop.f32.mrb[1].mxu1 }
  0xfc   : > { %v892_v41 = vadd.f32 %v1630_v28, %v659_v37  ;;  %v908_v42 = vadd.f32 %v1630_v28, %v723_v38  ;;  %v1406_v43 = vpop.f32.mrb[2].mxu0  ;;  %v1422_v44 = vpop.f32.mrb[2].mxu1  ;;  %v1352_v38 = vld [vmem:[%s1621_s19 + $0x28] sm:$0xff]  }
  0xfd   : > { %v990_v47 = vadd.f32 %v1290_v29, %v894_v35  ;;  %v1006_v48 = vadd.f32 %v1322_v30, %v910_v36  ;;  %v895_v49 = vadd.f32 %v1406_v43, %v1630_v28  ;;  %v911_v50 = vadd.f32 %v1422_v44, %v1630_v28  ;;  %v662_v51 = vpop.f32.mrb[3].mxu0  ;;  %v726_v52 = vpop.f32.mrb[3].mxu1  ;;  %v1351_v44 = vld [vmem:[%s1621_s19 + $0x20] sm:$0xff]  }
  0xfe   : > { %v988_v53 = vadd.f32 %v1286_v33, %v892_v41  ;;  %v1004_v54 = vadd.f32 %v1318_v34, %v908_v42  ;;  %v893_v55 = vadd.f32 %v1630_v28, %v662_v51  ;;  %v909_v56 = vadd.f32 %v1630_v28, %v726_v52 }
  0xff   : > { %v1022_v59 = vmax.f32 %v990_v47, 0.0  ;;  %v1038_v60 = vmax.f32 %v1006_v48, 0.0  ;;  %v991_v61 = vadd.f32 %v1291_v39, %v895_v49  ;;  %v1007_v62 = vadd.f32 %v1323_v40, %v911_v50  ;;  %v1360_v39 = vld [vmem:[%s1621_s19 + $0x68] sm:$0xff]  }
 0x100   : > { %v1020_v1 = vmax.f32 %v988_v53, 0.0  ;;  %v1036_v2 = vmax.f32 %v1004_v54, 0.0  ;;  %v989_v3 = vadd.f32 %v1287_v45, %v893_v55  ;;  %v1005_v4 = vadd.f32 %v1319_v46, %v909_v56  ;;  %v1359_v45 = vld [vmem:[%s1621_s19 + $0x60] sm:$0xff]  }
 0x101   : > { %1054 = vst [vmem:[%s1642_s24 + $0x10] sm:$0xff] %v1022_v59  ;;  %1070 = vst [vmem:[%s1642_s24 + $0x90] sm:$0xff] %v1038_v60  ;;  %v1023_v5 = vmax.f32 %v991_v61, 0.0  ;;  %v1039_v6 = vmax.f32 %v1007_v62, 0.0  ;;  %v1306_v52 = vunpack.c.l.bf16 %v1352_v38  ;;  %v1338_v53 = vunpack.c.l.bf16 %v1360_v39 }
 0x102   : > { %1052 = vst [vmem:[%s1642_s24] sm:$0xff] %v1020_v1  ;;  %1068 = vst [vmem:[%s1642_s24 + $0x80] sm:$0xff] %v1036_v2  ;;  %v1021_v9 = vmax.f32 %v989_v3, 0.0  ;;  %v1037_v10 = vmax.f32 %v1005_v4, 0.0  ;;  %v1409_v11 = vpop.f32.mrb[4].mxu0  ;;  %v1425_v12 = vpop.f32.mrb[4].mxu1  ;;  %v1302_v58 = vunpack.c.l.bf16 %v1351_v44  ;;  %v1334_v59 = vunpack.c.l.bf16 %v1359_v45 }
 0x103   : > { %1055 = vst [vmem:[%s1642_s24 + $0x18] sm:$0xff] %v1023_v5  ;;  %1071 = vst [vmem:[%s1642_s24 + $0x98] sm:$0xff] %v1039_v6  ;;  %v898_v15 = vadd.f32 %v1409_v11, %v1630_v28  ;;  %v914_v16 = vadd.f32 %v1425_v12, %v1630_v28  ;;  %v675_v17 = vpop.f32.mrb[5].mxu0  ;;  %v739_v18 = vpop.f32.mrb[5].mxu1  ;;  %v1307_v0 = vunpack.c.h.bf16 %v1352_v38  ;;  %v1339_v1 = vunpack.c.h.bf16 %v1360_v39 }
 0x104   : > { %1053 = vst [vmem:[%s1642_s24 + $0x8] sm:$0xff] %v1021_v9  ;;  %1069 = vst [vmem:[%s1642_s24 + $0x88] sm:$0xff] %v1037_v10  ;;  %v896_v21 = vadd.f32 %v1630_v28, %v675_v17  ;;  %v912_v22 = vadd.f32 %v1630_v28, %v739_v18  ;;  %v1410_v23 = vpop.f32.mrb[6].mxu0  ;;  %v1426_v24 = vpop.f32.mrb[6].mxu1  ;;  %v1303_v6 = vunpack.c.h.bf16 %v1351_v44  ;;  %v1354_v18 = vld [vmem:[%s1621_s19 + $0x38] sm:$0xff]  }
 0x105   : > { %v994_v27 = vadd.f32 %v1298_v7, %v898_v15  ;;  %v1010_v29 = vadd.f32 %v1330_v8, %v914_v16  ;;  %v899_v30 = vadd.f32 %v1410_v23, %v1630_v28  ;;  %v915_v31 = vadd.f32 %v1426_v24, %v1630_v28  ;;  %v678_v32 = vpop.f32.mrb[7].mxu0  ;;  %v742_v33 = vpop.f32.mrb[7].mxu1  ;;  %v1353_v24 = vld [vmem:[%s1621_s19 + $0x30] sm:$0xff]  }
 0x106   : > { %v992_v34 = vadd.f32 %v1294_v13, %v896_v21  ;;  %v1008_v35 = vadd.f32 %v1326_v14, %v912_v22  ;;  %v897_v36 = vadd.f32 %v1630_v28, %v678_v32  ;;  %v913_v37 = vadd.f32 %v1630_v28, %v742_v33 }
 0x107   : > { %v1026_v40 = vmax.f32 %v994_v27, 0.0  ;;  %v1042_v41 = vmax.f32 %v1010_v29, 0.0  ;;  %v995_v42 = vadd.f32 %v1299_v19, %v899_v30  ;;  %v1011_v43 = vadd.f32 %v1331_v20, %v915_v31  ;;  %v1362_v19 = vld [vmem:[%s1621_s19 + $0x78] sm:$0xff]  }
 0x108   : > { %v1024_v46 = vmax.f32 %v992_v34, 0.0  ;;  %v1040_v47 = vmax.f32 %v1008_v35, 0.0  ;;  %v993_v48 = vadd.f32 %v1295_v25, %v897_v36  ;;  %v1009_v49 = vadd.f32 %v1327_v26, %v913_v37  ;;  %v1361_v25 = vld [vmem:[%s1621_s19 + $0x70] sm:$0xff]  }
 0x109   : > { %1058 = vst [vmem:[%s1642_s24 + $0x30] sm:$0xff] %v1026_v40  ;;  %1074 = vst [vmem:[%s1642_s24 + $0xb0] sm:$0xff] %v1042_v41  ;;  %v1027_v50 = vmax.f32 %v995_v42, 0.0  ;;  %v1043_v51 = vmax.f32 %v1011_v43, 0.0  ;;  %v1335_v7 = vunpack.c.h.bf16 %v1359_v45  ;;  %v1314_v33 = vunpack.c.l.bf16 %v1354_v18 }
 0x10a   : > { %1056 = vst [vmem:[%s1642_s24 + $0x20] sm:$0xff] %v1024_v46  ;;  %1072 = vst [vmem:[%s1642_s24 + $0xa0] sm:$0xff] %v1040_v47  ;;  %v1025_v54 = vmax.f32 %v993_v48, 0.0  ;;  %v1041_v55 = vmax.f32 %v1009_v49, 0.0  ;;  %v1413_v56 = vpop.f32.mrb[8].mxu0  ;;  %v1429_v57 = vpop.f32.mrb[8].mxu1  ;;  %v1346_v34 = vunpack.c.l.bf16 %v1362_v19  ;;  %v1310_v39 = vunpack.c.l.bf16 %v1353_v24 }
 0x10b   : > { %1059 = vst [vmem:[%s1642_s24 + $0x38] sm:$0xff] %v1027_v50  ;;  %1075 = vst [vmem:[%s1642_s24 + $0xb8] sm:$0xff] %v1043_v51  ;;  %v902_v60 = vadd.f32 %v1413_v56, %v1630_v28  ;;  %v918_v61 = vadd.f32 %v1429_v57, %v1630_v28  ;;  %v691_v62 = vpop.f32.mrb[9].mxu0  ;;  %v755_v63 = vpop.f32.mrb[9].mxu1  ;;  %v1342_v40 = vunpack.c.l.bf16 %v1361_v25  ;;  %v1315_v45 = vunpack.c.h.bf16 %v1354_v18 }
 0x10c   : > { %1057 = vst [vmem:[%s1642_s24 + $0x28] sm:$0xff] %v1025_v54  ;;  %1073 = vst [vmem:[%s1642_s24 + $0xa8] sm:$0xff] %v1041_v55  ;;  %v900_v2 = vadd.f32 %v1630_v28, %v691_v62  ;;  %v916_v3 = vadd.f32 %v1630_v28, %v755_v63  ;;  %v1414_v4 = vpop.f32.mrb[10].mxu0  ;;  %v1430_v5 = vpop.f32.mrb[10].mxu1  ;;  %v1347_v46 = vunpack.c.h.bf16 %v1362_v19  ;;  %v1311_v51 = vunpack.c.h.bf16 %v1353_v24 }
 0x10d   : > { %v998_v8 = vadd.f32 %v1306_v52, %v902_v60  ;;  %v1014_v9 = vadd.f32 %v1338_v53, %v918_v61  ;;  %v903_v10 = vadd.f32 %v1414_v4, %v1630_v28  ;;  %v919_v11 = vadd.f32 %v1430_v5, %v1630_v28  ;;  %v694_v12 = vpop.f32.mrb[11].mxu0  ;;  %v758_v13 = vpop.f32.mrb[11].mxu1 }
 0x10e   : > { %v996_v14 = vadd.f32 %v1302_v58, %v900_v2  ;;  %v1012_v15 = vadd.f32 %v1334_v59, %v916_v3  ;;  %v901_v16 = vadd.f32 %v1630_v28, %v694_v12  ;;  %v917_v17 = vadd.f32 %v1630_v28, %v758_v13 }
 0x10f   : > { %v1030_v20 = vmax.f32 %v998_v8, 0.0  ;;  %v1046_v21 = vmax.f32 %v1014_v9, 0.0  ;;  %v999_v22 = vadd.f32 %v1307_v0, %v903_v10  ;;  %v1015_v23 = vadd.f32 %v1339_v1, %v919_v11 }
 0x110   : > { %v1028_v26 = vmax.f32 %v996_v14, 0.0  ;;  %v1044_v27 = vmax.f32 %v1012_v15, 0.0  ;;  %v997_v29 = vadd.f32 %v1303_v6, %v901_v16  ;;  %v1013_v30 = vadd.f32 %v1335_v7, %v917_v17 }
 0x111   : > { %1062 = vst [vmem:[%s1642_s24 + $0x50] sm:$0xff] %v1030_v20  ;;  %1078 = vst [vmem:[%s1642_s24 + $0xd0] sm:$0xff] %v1046_v21  ;;  %v1031_v31 = vmax.f32 %v999_v22, 0.0  ;;  %v1047_v32 = vmax.f32 %v1015_v23, 0.0  ;;  %v1343_v52 = vunpack.c.h.bf16 %v1361_v25 }
 0x112   : > { %1060 = vst [vmem:[%s1642_s24 + $0x40] sm:$0xff] %v1028_v26  ;;  %1076 = vst [vmem:[%s1642_s24 + $0xc0] sm:$0xff] %v1044_v27  ;;  %v1029_v35 = vmax.f32 %v997_v29, 0.0  ;;  %v1045_v36 = vmax.f32 %v1013_v30, 0.0  ;;  %v1417_v37 = vpop.f32.mrb[12].mxu0  ;;  %v1433_v38 = vpop.f32.mrb[12].mxu1 }
 0x113   : > { %1063 = vst [vmem:[%s1642_s24 + $0x58] sm:$0xff] %v1031_v31  ;;  %1079 = vst [vmem:[%s1642_s24 + $0xd8] sm:$0xff] %v1047_v32  ;;  %v906_v41 = vadd.f32 %v1417_v37, %v1630_v28  ;;  %v922_v42 = vadd.f32 %v1433_v38, %v1630_v28  ;;  %v707_v43 = vpop.f32.mrb[13].mxu0  ;;  %v771_v44 = vpop.f32.mrb[13].mxu1 }
 0x114   : > { %1061 = vst [vmem:[%s1642_s24 + $0x48] sm:$0xff] %v1029_v35  ;;  %1077 = vst [vmem:[%s1642_s24 + $0xc8] sm:$0xff] %v1045_v36  ;;  %v904_v47 = vadd.f32 %v1630_v28, %v707_v43  ;;  %v920_v48 = vadd.f32 %v1630_v28, %v771_v44  ;;  %v1418_v49 = vpop.f32.mrb[14].mxu0  ;;  %v1434_v50 = vpop.f32.mrb[14].mxu1 }
 0x115   : > { %v1002_v53 = vadd.f32 %v1314_v33, %v906_v41  ;;  %v1018_v54 = vadd.f32 %v1346_v34, %v922_v42  ;;  %v907_v55 = vadd.f32 %v1418_v49, %v1630_v28  ;;  %v923_v56 = vadd.f32 %v1434_v50, %v1630_v28  ;;  %v710_v57 = vpop.f32.mrb[15].mxu0  ;;  %v774_v58 = vpop.f32.mrb[15].mxu1 }
 0x116   : > { %v1000_v59 = vadd.f32 %v1310_v39, %v904_v47  ;;  %v1016_v60 = vadd.f32 %v1342_v40, %v920_v48  ;;  %v905_v61 = vadd.f32 %v1630_v28, %v710_v57  ;;  %v921_v62 = vadd.f32 %v1630_v28, %v774_v58 }
 0x117   : > { %v1034_v63 = vmax.f32 %v1002_v53, 0.0  ;;  %v1050_v0 = vmax.f32 %v1018_v54, 0.0  ;;  %v1003_v1 = vadd.f32 %v1315_v45, %v907_v55  ;;  %v1019_v2 = vadd.f32 %v1347_v46, %v923_v56 }
 0x118   : > { %v1032_v3 = vmax.f32 %v1000_v59, 0.0  ;;  %v1048_v4 = vmax.f32 %v1016_v60, 0.0  ;;  %v1001_v5 = vadd.f32 %v1311_v51, %v905_v61  ;;  %v1017_v6 = vadd.f32 %v1343_v52, %v921_v62 }
 0x119   : > { %1066 = vst [vmem:[%s1642_s24 + $0x70] sm:$0xff] %v1034_v63  ;;  %1082 = vst [vmem:[%s1642_s24 + $0xf0] sm:$0xff] %v1050_v0  ;;  %v1035_v7 = vmax.f32 %v1003_v1, 0.0  ;;  %v1051_v8 = vmax.f32 %v1019_v2, 0.0 }
 0x11a   : > { %1064 = vst [vmem:[%s1642_s24 + $0x60] sm:$0xff] %v1032_v3  ;;  %1080 = vst [vmem:[%s1642_s24 + $0xe0] sm:$0xff] %v1048_v4  ;;  %v1033_v9 = vmax.f32 %v1001_v5, 0.0  ;;  %v1049_v28 = vmax.f32 %v1017_v6, 0.0 }
 0x11b   : > { %1067 = vst [vmem:[%s1642_s24 + $0x78] sm:$0xff] %v1035_v7  ;;  %1083 = vst [vmem:[%s1642_s24 + $0xf8] sm:$0xff] %v1051_v8 }
 0x11c   : > { %1065 = vst [vmem:[%s1642_s24 + $0x68] sm:$0xff] %v1033_v9  ;;  %1081 = vst [vmem:[%s1642_s24 + $0xe8] sm:$0xff] %v1049_v28 }
 0x11d PF: > { %s14_s17 = sadd.s32 1, %s1521_s17   ;;  %s1728_s15 = smov %s1517_s16 }
 0x11e   : > { %p11_p5 = scmp.ge.s32.totalorder %s14_s17, 4   ;;  %s1729_s16 = smov %s1731_s18 }
 0x120   :  { %13 = sbr.rel (!%p11_p5) target bundleno = 2 (0x2), region = 83 }

</bundles_post_ra>
